<compile_context>
chip_gen: v7x
topology: tpu7x:2x2x1
jax: 0.10.0
libtpu: 0.0.40
codegen_flags: <defaults>
</compile_context>

<pallas_src>
import functools
import math

import jax
import jax.numpy as jnp
from jax import lax
from jax.experimental import pallas as pl
from jax.experimental.pallas import tpu as pltpu


# ----------------------------------------------------------------------------
# Buffer construction (mirrors PositionalEncoder.__init__, batch_first=True)
# ----------------------------------------------------------------------------
def make_positional_encoding(max_seq_len: int, d_model: int) -> jnp.ndarray:
    """Sinusoidal PE table, shape [max_seq_len, d_model] (float32)."""
    position = jnp.arange(max_seq_len, dtype=jnp.float32)[:, None]            # (L, 1)
    div_term = jnp.exp(
        jnp.arange(0, d_model, 2, dtype=jnp.float32) * (-math.log(10000.0) / d_model)
    )                                                                          # (D/2,)
    sin = jnp.sin(position * div_term)                                         # (L, D/2)
    cos = jnp.cos(position * div_term)                                         # (L, D/2)
    # Interleave: even columns <- sin, odd columns <- cos.
    pe = jnp.stack([sin, cos], axis=-1).reshape(max_seq_len, d_model)
    return pe


# ----------------------------------------------------------------------------
# Tile-size helpers
# ----------------------------------------------------------------------------
def _largest_divisor_leq(n: int, cap: int) -> int:
    cap = max(1, min(n, cap))
    for t in range(cap, 0, -1):
        if n % t == 0:
            return t
    return 1


def _largest_divisor_leq_mult(n: int, cap: int, mult: int) -> int:
    """Largest divisor of n that is <= cap and a multiple of `mult`; else n."""
    cap = max(1, min(n, cap))
    for t in range(cap, 0, -1):
        if n % t == 0 and t % mult == 0:
            return t
    return n  # fall back to the full extent (always legal for BlockSpec)


# ----------------------------------------------------------------------------
# Pallas kernel: x + pe (broadcast over batch), then inverted dropout.
# Block shapes: x/o -> (bB, tR, L), pe -> (tR, L).
# ----------------------------------------------------------------------------
def _pos_enc_kernel(seed_ref, x_ref, pe_ref, o_ref, *,
                    dropout_p, training, rows_per_batch, lanes, block_b, block_r):
    y = x_ref[...] + pe_ref[...][None, :, :]

    if training and dropout_p > 0.0:
        gb = pl.program_id(0)
        gr = pl.program_id(1)
        shp = y.shape
        # Global element index (unique per element, independent of tiling).
        bi = lax.broadcasted_iota(jnp.int32, shp, 0) + gb * block_b
        ri = lax.broadcasted_iota(jnp.int32, shp, 1) + gr * block_r
        li = lax.broadcasted_iota(jnp.int32, shp, 2)
        gidx = (bi * rows_per_batch + ri) * lanes + li

        # Stateless "lowbias32" hash of (index + seed) -> uniform uint32.
        h = gidx.astype(jnp.uint32) + seed_ref[0].astype(jnp.uint32)
        h = h ^ (h >> 16)
        h = h * jnp.uint32(0x7FEB352D)
        h = h ^ (h >> 15)
        h = h * jnp.uint32(0x846CA68B)
        h = h ^ (h >> 16)

        keep_prob = 1.0 - dropout_p
        # NOTE: threshold clamp introduces at most a 2^-32 bias in keep prob.
        threshold = jnp.uint32(min(int(keep_prob * 2**32), 2**32 - 1))
        keep = h < threshold
        scale = jnp.asarray(1.0 / keep_prob, dtype=y.dtype)
        y = jnp.where(keep, y * scale, jnp.zeros_like(y))

    o_ref[...] = y.astype(o_ref.dtype)


# ----------------------------------------------------------------------------
# Wrapper (the module forward, batch_first=True: x is [B, S, D])
# ----------------------------------------------------------------------------
def positional_encoder_forward(
    x: jnp.ndarray,
    pe: jnp.ndarray,
    seed: int = 0,
    dropout_p: float = 0.1,
    training: bool = True,
) -> jnp.ndarray:
    B, S, D = x.shape
    assert pe.shape[0] >= S and pe.shape[1] == D
    pe_s = pe[:S].astype(x.dtype)  # mirrors self.pe[:, :x.size(1)]; dtype-native compute

    # Lane-dense view: last dim a multiple of 128 whenever possible.
    if (S * D) % 128 == 0:
        L = 128
        R = (S * D) // 128
        x_v = x.reshape(B, R, L)
        pe_v = pe_s.reshape(R, L)
    else:
        # TODO(synk): pad the last dim to 128 lanes for fully dense stores when
        # S*D is not a multiple of 128; falling back to the natural layout here.
        L = D
        R = S
        x_v = x
        pe_v = pe_s

    itemsize = jnp.dtype(x.dtype).itemsize
    target_block_bytes = 4 * 1024 * 1024          # per x-block target (~4 MiB)
    max_rows = max(1, target_block_bytes // (L * itemsize))

    if R <= max_rows:
        # Small per-batch slab: pack several batch elements per grid step.
        tR = R
        bB = _largest_divisor_leq(B, max(1, max_rows // R))
    else:
        # Large per-batch slab: one batch per step, tile rows (multiple of 8).
        bB = 1
        tR = _largest_divisor_leq_mult(R, max_rows, 8)

    grid = (B // bB, R // tR)

    x_block_bytes = bB * tR * L * itemsize
    pe_block_bytes = tR * L * itemsize
    # Double-buffered x in, pe in, out; plus headroom.  Cap below v7x VMEM.
    vmem_need = 2 * (2 * x_block_bytes + pe_block_bytes) + (2 << 20)
    vmem_limit = int(min(max(vmem_need, 16 << 20), 48 << 20))

    seed_arr = jnp.asarray([seed], dtype=jnp.int32)

    kernel = functools.partial(
        _pos_enc_kernel,
        dropout_p=float(dropout_p),
        training=bool(training),
        rows_per_batch=R,
        lanes=L,
        block_b=bB,
        block_r=tR,
    )

    out = pl.pallas_call(
        kernel,
        out_shape=jax.ShapeDtypeStruct((B, R, L), x.dtype),
        grid_spec=pltpu.PrefetchScalarGridSpec(
            num_scalar_prefetch=1,                 # seed lands in SMEM
            grid=grid,
            in_specs=[
                pl.BlockSpec((bB, tR, L), lambda gb, gr, seed: (gb, gr, 0)),
                pl.BlockSpec((tR, L), lambda gb, gr, seed: (gr, 0)),
            ],
            out_specs=pl.BlockSpec((bB, tR, L), lambda gb, gr, seed: (gb, gr, 0)),
        ),
        compiler_params=pltpu.CompilerParams(
            dimension_semantics=("parallel", "parallel"),  # stateless RNG -> safe
            vmem_limit_bytes=vmem_limit,
        ),
    )(seed_arr, x_v, pe_v)

    return out.reshape(B, S, D)


# ----------------------------------------------------------------------------
# Demo / smoke test
# ----------------------------------------------------------------------------
if __name__ == "__main__":
    B, S, D = 2, 8, 32
    MAX_SEQ_LEN = 64
    DROPOUT_P = 0.1

    key = jax.random.PRNGKey(0)
    x = jax.random.normal(key, (B, S, D), dtype=jnp.float32)
    pe = make_positional_encoding(MAX_SEQ_LEN, D)
    ref_eval = x + pe[:S][None, :, :]

    # 1) Eval-mode pass (dropout disabled) — check against pure-JAX reference.
    out_eval = positional_encoder_forward(
        x, pe, seed=0, dropout_p=DROPOUT_P, training=False
    )
    out_eval = jax.block_until_ready(out_eval)
    assert out_eval.shape == (B, S, D)
    assert jnp.allclose(out_eval, ref_eval, atol=1e-5, rtol=1e-5), "eval mismatch"

    # 2) Training-mode pass (dropout active, deterministic in-kernel hash RNG).
    out_train = positional_encoder_forward(
        x, pe, seed=123, dropout_p=DROPOUT_P, training=True
    )
    out_train = jax.block_until_ready(out_train)
    assert out_train.shape == (B, S, D)
    keep_scale = 1.0 / (1.0 - DROPOUT_P)
    is_zero = jnp.isclose(out_train, 0.0, atol=1e-6)
    is_scaled = jnp.isclose(out_train, ref_eval * keep_scale, atol=1e-5, rtol=1e-5)
    assert bool(jnp.all(is_zero | is_scaled)), "dropout semantics mismatch"
    # Some elements kept and some dropped (p=0.1 over 512 elements).
    assert bool(jnp.any(is_zero)) and bool(jnp.any(~is_zero)), "degenerate dropout mask"

    print("KERNEL_OK")
</pallas_src>

<mosaic_0001>
module attributes {stable_mosaic.version = 11 : i64} {
  func.func @_pos_enc_kernel(%arg0: i32, %arg1: i32, %arg2: memref<1xi32, #tpu.memory_space<smem>>, %arg3: memref<2x2x128xf32, #tpu.memory_space<vmem>>, %arg4: memref<2x128xf32, #tpu.memory_space<vmem>>, %arg5: memref<2x2x128xf32, #tpu.memory_space<vmem>>) attributes {dimension_semantics = [#tpu.dimension_semantics<parallel>, #tpu.dimension_semantics<parallel>], iteration_bounds = array<i64: 1, 1>, scalar_prefetch = 1 : i64, scratch_operands = 0 : i64, tpu.core_type = #tpu.core_type<tc>, window_params = [{transform_indices = @transform_0, window_bounds = array<i64: 2, 2, 128>}, {transform_indices = @transform_1, window_bounds = array<i64: 2, 128>}, {transform_indices = @transform_2, window_bounds = array<i64: 2, 2, 128>}]} {
    %c0 = arith.constant 0 : index
    %c0_0 = arith.constant 0 : index
    %c0_1 = arith.constant 0 : index
    %0 = vector.load %arg3[%c0, %c0_0, %c0_1] : memref<2x2x128xf32, #tpu.memory_space<vmem>>, vector<2x2x128xf32>
    %c0_2 = arith.constant 0 : index
    %c0_3 = arith.constant 0 : index
    %1 = vector.load %arg4[%c0_2, %c0_3] : memref<2x128xf32, #tpu.memory_space<vmem>>, vector<2x128xf32>
    %2 = vector.shape_cast %1 : vector<2x128xf32> to vector<1x2x128xf32>
    %3 = vector.broadcast %2 : vector<1x2x128xf32> to vector<2x2x128xf32>
    %4 = arith.addf %0, %3 : vector<2x2x128xf32>
    %c0_4 = arith.constant 0 : index
    %c0_5 = arith.constant 0 : index
    %c0_6 = arith.constant 0 : index
    %5 = vector.load %arg5[%c0_4, %c0_5, %c0_6] : memref<2x2x128xf32, #tpu.memory_space<vmem>>, vector<2x2x128xf32>
    tpu.vector_store %arg5[%c0_4, %c0_5, %c0_6], %4 {strides = array<i32>} : memref<2x2x128xf32, #tpu.memory_space<vmem>>, vector<2x2x128xf32>,
    return
  }
  func.func @transform_0(%arg0: i32, %arg1: i32, %arg2: memref<1xi32, #tpu.memory_space<smem>>) -> (i32, i32, i32) {
    %c0_i32 = arith.constant 0 : i32
    %c0_i32_0 = arith.constant 0 : i32
    return %arg0, %arg1, %c0_i32 : i32, i32, i32
  }
  func.func @transform_1(%arg0: i32, %arg1: i32, %arg2: memref<1xi32, #tpu.memory_space<smem>>) -> (i32, i32) {
    %c0_i32 = arith.constant 0 : i32
    %c0_i32_0 = arith.constant 0 : i32
    return %arg1, %c0_i32 : i32, i32
  }
  func.func @transform_2(%arg0: i32, %arg1: i32, %arg2: memref<1xi32, #tpu.memory_space<smem>>) -> (i32, i32, i32) {
    %c0_i32 = arith.constant 0 : i32
    %c0_i32_0 = arith.constant 0 : i32
    return %arg0, %arg1, %c0_i32 : i32, i32, i32
  }
}

</mosaic_0001>

<bundles_post_ra>
// kernel: tpu_custom_call.1
= control target key start
LH: loop header
LB: loop body
LE: loop exit
PB: predicated region body
PF: predicated region fallthrough
CT: control target
= control target key end

     0   :  { %9 = vsyncpa [#allocation5], 0  ;;  %s161_s0 = inlined_call_operand.<no memory space> [shape: s32[1], index: 0, kind: input, shape index: {}]   ;;  %s162_s1 = inlined_call_operand.hbm [shape: f32[2,2,128], index: 1, kind: input, shape index: {}]   ;;  %s163_s2 = inlined_call_operand.vmem [shape: f32[2,128], index: 2, kind: input, shape index: {}]   ;;  %s164_s3 = inlined_call_operand.hbm [shape: f32[2,2,128], index: 3, kind: output, shape index: {}]  }
   0x1   :  { %10 = vsyncpa [#allocation6], 0  ;;  %s104_s12 = smov [#allocation4]   ;;  %s56_s16 = scalar_lea.hbm %s162_s1, 64 }
   0x2   :  { %s16_s13 = sshll.u32 %s104_s12, 4  ;;  %p57_p0 = scmp.ne.s32.totalorder %s162_s1, %s56_s16  ;;  %s17_s13 = int_to_ptr.vmem [resolvable:$true] %s16_s13 }
   0x3   :  { %p60_p1 = scmp.lt.u32.totalorder %s56_s16, %s162_s1 }
   0x5   :  { %p62_p2 = pnand %p60_p1, %p57_p0 }
   0x7   :  { %65 = shalt.err (!%p62_p2)
}
   0x8   :  { %s66_s20 = scalar_lea.vmem %s17_s13, 64  ;;  %p71_p4 = scmp.lt.s32.totalorder %s17_s13, %s17_s13 }
   0x9   :  { %p67_p3 = scmp.ne.s32.totalorder %s17_s13, %s66_s20  ;;  %p72_p5 = scmp.lt.s32.totalorder %s66_s20, %s66_s20 }
   0xb   :  { %p73_p6 = por %p72_p5, %p71_p4 }
   0xd   :  { %p74_p7 = pnand %p73_p6, %p67_p3 }
   0xf   :  { %77 = shalt.err (!%p74_p7)
}
  0x10   :  { %s105_s21 = smov 32   ;;  %s106_s22 = smov 2  }
  0x11   :  { %22 = dma.hbm_to_vmem [thread:$0]  %s162_s1, 64, %s17_s13, [#allocation5], %s105_s21, %s105_s21, %s106_s22  }
  0x12   :  { %100 = dma.done.wait [#allocation5], 64  }
  0x13   :  { %101 = vsyncadd [#allocation5], 4294967232  ;;  %s107_s25 = smov [#allocation7]   ;;  %v28_v0 = vld [vmem:[#allocation4] sm:$0x3] }
  0x14   :  { %s40_s26 = sshll.u32 %s107_s25, 4  ;;  %v30_v1 = vld [vmem:[%s163_s2] sm:$0x3]  ;;  %v29_v2 = vld [vmem:[#allocation4 + $0x2] sm:$0x3]  ;;  %s41_s26 = int_to_ptr.vmem [resolvable:$true] %s40_s26 }
  0x15   :  { %v31_v3 = vadd.f32 %v30_v1, %v28_v0  ;;  %v32_v4 = vadd.f32 %v30_v1, %v29_v2  ;;  %s78_s29 = scalar_lea.vmem %s41_s26, 64  ;;  %p83_p9 = scmp.lt.s32.totalorder %s41_s26, %s41_s26 }
  0x16   :  { %p79_p8 = scmp.ne.s32.totalorder %s41_s26, %s78_s29  ;;  %p84_p10 = scmp.lt.s32.totalorder %s78_s29, %s78_s29 }
  0x17   :  { %33 = vst [vmem:[#allocation7] sm:$0x3] %v31_v3  ;;  %34 = vst [vmem:[#allocation7 + $0x2] sm:$0x3] %v32_v4 }
  0x18   :  { %p85_p11 = por %p84_p10, %p83_p9 }
  0x1a   :  { %p86_p12 = pnand %p85_p11, %p79_p8 }
  0x1c   :  { %89 = shalt.err (!%p86_p12)
}
  0x1d   :  { %s90_s4 = scalar_lea.hbm %s164_s3, 64 }
  0x1e   :  { %p91_p13 = scmp.ne.s32.totalorder %s164_s3, %s90_s4  ;;  %p94_p0 = scmp.lt.u32.totalorder %s90_s4, %s164_s3 }
  0x20   :  { %p96_p1 = pnand %p94_p0, %p91_p13 }
  0x22   :  { %99 = shalt.err (!%p96_p1)
}
  0x23   :  { %46 = dma.vmem_to_hbm [thread:$0]  %s41_s26, 64, %s164_s3, [#allocation6], %s105_s21, %s105_s21, %s106_s22  }
  0x24   :  { %102 = dma.done.wait [#allocation6], 64  }
  0x25   :  { %103 = vsyncadd [#allocation6], 4294967232 }
  0x26   :  { %50 = vsyncpa [#allocation5], 1 }
  0x27   :  { %51 = vsyncpa [#allocation6], 1 }

</bundles_post_ra>
